<compile_context>
chip_gen: v6e
topology: v6e:2x2x1
jax: 0.10.0
libtpu: 0.0.40
codegen_flags: <defaults>
</compile_context>

<pallas_src>
import functools

import jax
import jax.numpy as jnp
from jax import lax
from jax.experimental import pallas as pl
from jax.experimental.pallas import tpu as pltpu


# --------------------------------------------------------------- tile utils --

def _pick_tile(dim, target, align):
    """Largest tile <= target that divides `dim` and is a multiple of `align`,
    or the full dim when it is already small enough (full-dim blocks are legal)."""
    if dim <= target:
        return dim
    t = (target // align) * align
    while t >= align:
        if dim % t == 0:
            return t
        t -= align
    return dim


def _vmem_limit(block_bytes):
    """Scoped-VMEM request: ~2x (double buffering) + headroom, clamped to 48 MiB
    so the same tile set stays inside v7x's 64 MiB physical VMEM."""
    est = 2 * block_bytes + (4 << 20)
    return int(min(max(est, 32 << 20), 48 << 20))


# ------------------------------------------------------------------ kernels --

def _inproj_kernel(x_ref, w_ref, b_ref, pos_ref, o_ref, acc_ref):
    """out[b] = x[b] @ W + b + pos  (K-tiled, positional-encoding add fused)."""
    k = pl.program_id(2)

    @pl.when(k == 0)
    def _():
        acc_ref[...] = jnp.zeros_like(acc_ref)

    acc_ref[...] += jnp.dot(x_ref[0], w_ref[...],
                            preferred_element_type=jnp.float32)

    @pl.when(k == pl.num_programs(2) - 1)
    def _():
        y = (acc_ref[...] + b_ref[...].astype(jnp.float32)
             + pos_ref[...].astype(jnp.float32))
        o_ref[0] = y.astype(o_ref.dtype)


def _attn_block_kernel(xkv_ref, xq_ref, wq_ref, wk_ref, wv_ref,
                       bq_ref, bk_ref, bv_ref, wo_ref, bo_ref,
                       g_ref, bln_ref, o_ref, acc_ref, *, scale, eps):
    """One head per grid step (reduction axis): fused qkv projection ->
    softmax(q k^T) v -> out-projection (accumulated over heads) -> residual
    add -> LayerNorm.  No qkv / attention intermediates touch HBM."""
    h = pl.program_id(2)

    @pl.when(h == 0)
    def _():
        acc_ref[...] = jnp.zeros_like(acc_ref)

    xkv = xkv_ref[0]                       # (S,  D) bf16 — context rows for K/V
    xq = xq_ref[0]                         # (tq, D) bf16 — query rows / residual

    # Per-head projections: contraction depth D keeps the MXU pipe full.
    q = jnp.dot(xq, wq_ref[0], preferred_element_type=jnp.float32) + bq_ref[0]
    k = jnp.dot(xkv, wk_ref[0], preferred_element_type=jnp.float32) + bk_ref[0]
    v = jnp.dot(xkv, wv_ref[0], preferred_element_type=jnp.float32) + bv_ref[0]
    q = q * scale                          # scale Q (tq*hd) instead of scores (tq*S)

    # scores = q @ k^T via dot_general contracting the last dims (no transpose).
    s = lax.dot_general(q.astype(jnp.bfloat16), k.astype(jnp.bfloat16),
                        (((1,), (1,)), ((), ())),
                        preferred_element_type=jnp.float32)         # (tq, S)
    m = jnp.max(s, axis=-1, keepdims=True)
    p = jnp.exp(s - m)
    denom = jnp.sum(p, axis=-1, keepdims=True)
    p = p * pl.reciprocal(denom, approx=True)                       # EUP slot

    o_h = jnp.dot(p.astype(jnp.bfloat16), v.astype(jnp.bfloat16),
                  preferred_element_type=jnp.float32)               # (tq, hd)

    # Out-projection folded into the head reduction: sum_h o_h @ Wo[h].
    acc_ref[...] += jnp.dot(o_h.astype(jnp.bfloat16), wo_ref[0],
                            preferred_element_type=jnp.float32)     # (tq, D)

    @pl.when(h == pl.num_programs(2) - 1)
    def _():
        z = (acc_ref[...] + bo_ref[...].astype(jnp.float32)
             + xq.astype(jnp.float32))                              # residual
        mean = jnp.mean(z, axis=-1, keepdims=True)
        c = z - mean
        var = jnp.mean(c * c, axis=-1, keepdims=True)
        y = c * lax.rsqrt(var + eps)
        y = y * g_ref[...].astype(jnp.float32) + bln_ref[...].astype(jnp.float32)
        o_ref[0] = y.astype(o_ref.dtype)


def _ffn_kernel(x_ref, w1_ref, b1_ref, w2_ref, b2_ref, g_ref, bln_ref,
                o_ref, acc_ref, *, eps):
    """LayerNorm(x + relu(x @ W1 + b1) @ W2 + b2), F-tiled: the ReLU
    intermediate is only (tm, tf) and never leaves the chip."""
    f = pl.program_id(1)

    @pl.when(f == 0)
    def _():
        acc_ref[...] = jnp.zeros_like(acc_ref)

    x = x_ref[...]                                              # (tm, D) bf16
    t = jnp.dot(x, w1_ref[...], preferred_element_type=jnp.float32)
    t = jnp.maximum(t + b1_ref[...].astype(jnp.float32), 0.0)   # (tm, tf)
    acc_ref[...] += jnp.dot(t.astype(jnp.bfloat16), w2_ref[...],
                            preferred_element_type=jnp.float32)

    @pl.when(f == pl.num_programs(1) - 1)
    def _():
        z = (acc_ref[...] + b2_ref[...].astype(jnp.float32)
             + x.astype(jnp.float32))                           # residual
        mean = jnp.mean(z, axis=-1, keepdims=True)
        c = z - mean
        var = jnp.mean(c * c, axis=-1, keepdims=True)
        y = c * lax.rsqrt(var + eps)
        y = y * g_ref[...].astype(jnp.float32) + bln_ref[...].astype(jnp.float32)
        o_ref[...] = y.astype(o_ref.dtype)


# ----------------------------------------------------------------- wrappers --

def input_projection(x, w, b, pos, *, out_dtype=jnp.bfloat16, tn=256, tk=512):
    """x: (B, S, Din), w: (Din, D) bf16, b: (D,), pos: (S, D) -> (B, S, D)."""
    B, S, Din = x.shape
    D = w.shape[1]
    tn = _pick_tile(D, tn, 128)
    tk = _pick_tile(Din, tk, 128)
    x = x.astype(jnp.bfloat16)          # halve the activation DMA bytes
    blk_bytes = (S * tk * 2 + tk * tn * 2 + tn * 4 + S * tn * 4
                 + S * tn * 4 + S * tn * 2)
    return pl.pallas_call(
        _inproj_kernel,
        out_shape=jax.ShapeDtypeStruct((B, S, D), out_dtype),
        grid=(B, D // tn, Din // tk),
        in_specs=[pl.BlockSpec((1, S, tk), lambda b_, n, k: (b_, 0, k)),
                  pl.BlockSpec((tk, tn), lambda b_, n, k: (k, n)),
                  pl.BlockSpec((1, tn), lambda b_, n, k: (0, n)),
                  pl.BlockSpec((S, tn), lambda b_, n, k: (0, n))],
        out_specs=pl.BlockSpec((1, S, tn), lambda b_, n, k: (b_, 0, n)),
        scratch_shapes=[pltpu.VMEM((S, tn), jnp.float32)],
        compiler_params=pltpu.CompilerParams(
            dimension_semantics=("parallel", "parallel", "arbitrary"),
            vmem_limit_bytes=_vmem_limit(blk_bytes)),
    )(x, w, b.reshape(1, D), pos)


def attention_block(h, lp, *, num_heads, scale, eps=1e-5,
                    out_dtype=jnp.bfloat16, tq=256):
    """Fused qkv projection + multi-head attention + out-projection + residual
    + LayerNorm.  h: (B, S, D) -> (B, S, D)."""
    B, S, D = h.shape
    hd = D // num_heads
    tq = _pick_tile(S, tq, 16)
    blk_bytes = (S * D * 2 + tq * D * 2                  # xkv + xq blocks
                 + 3 * D * hd * 2 + 3 * hd * 4           # per-head qkv weights/bias
                 + hd * D * 2 + 3 * D * 4                # wo + bo/gamma/beta
                 + tq * D * 4 + tq * S * 4 + tq * D * 2)  # acc + scores + out
    return pl.pallas_call(
        functools.partial(_attn_block_kernel, scale=scale, eps=eps),
        out_shape=jax.ShapeDtypeStruct((B, S, D), out_dtype),
        grid=(B, S // tq, num_heads),
        in_specs=[
            pl.BlockSpec((1, S, D), lambda b, qi, hh: (b, 0, 0)),    # K/V context
            pl.BlockSpec((1, tq, D), lambda b, qi, hh: (b, qi, 0)),  # Q rows / residual
            pl.BlockSpec((1, D, hd), lambda b, qi, hh: (hh, 0, 0)),  # Wq[h]
            pl.BlockSpec((1, D, hd), lambda b, qi, hh: (hh, 0, 0)),  # Wk[h]
            pl.BlockSpec((1, D, hd), lambda b, qi, hh: (hh, 0, 0)),  # Wv[h]
            pl.BlockSpec((1, 1, hd), lambda b, qi, hh: (hh, 0, 0)),  # bq[h]
            pl.BlockSpec((1, 1, hd), lambda b, qi, hh: (hh, 0, 0)),  # bk[h]
            pl.BlockSpec((1, 1, hd), lambda b, qi, hh: (hh, 0, 0)),  # bv[h]
            pl.BlockSpec((1, hd, D), lambda b, qi, hh: (hh, 0, 0)),  # Wo[h]
            pl.BlockSpec((1, D), lambda b, qi, hh: (0, 0)),          # bo
            pl.BlockSpec((1, D), lambda b, qi, hh: (0, 0)),          # LN gamma
            pl.BlockSpec((1, D), lambda b, qi, hh: (0, 0)),          # LN beta
        ],
        out_specs=pl.BlockSpec((1, tq, D), lambda b, qi, hh: (b, qi, 0)),
        scratch_shapes=[pltpu.VMEM((tq, D), jnp.float32)],
        compiler_params=pltpu.CompilerParams(
            dimension_semantics=("parallel", "parallel", "arbitrary"),
            vmem_limit_bytes=_vmem_limit(blk_bytes)),
    )(h, h, lp["wq"], lp["wk"], lp["wv"], lp["bq"], lp["bk"], lp["bv"],
      lp["wo"], lp["bo"], lp["ln1_g"].reshape(1, D), lp["ln1_b"].reshape(1, D))


def ffn_block(x, lp, *, eps=1e-5, out_dtype=jnp.bfloat16, tm=256, tf=512):
    """Fused LayerNorm(x + relu(x@W1+b1)@W2+b2), F-tiled.  x: (M, D)."""
    M, D = x.shape
    F = lp["ff1_w"].shape[1]
    tm = _pick_tile(M, tm, 16)
    tf = _pick_tile(F, tf, 128)
    blk_bytes = (tm * D * 2 + D * tf * 2 + tf * 4 + tf * D * 2 + 3 * D * 4
                 + tm * D * 4 + tm * tf * 4 + tm * D * 2)
    return pl.pallas_call(
        functools.partial(_ffn_kernel, eps=eps),
        out_shape=jax.ShapeDtypeStruct((M, D), out_dtype),
        grid=(M // tm, F // tf),
        in_specs=[pl.BlockSpec((tm, D), lambda i, f: (i, 0)),
                  pl.BlockSpec((D, tf), lambda i, f: (0, f)),
                  pl.BlockSpec((1, tf), lambda i, f: (0, f)),
                  pl.BlockSpec((tf, D), lambda i, f: (f, 0)),
                  pl.BlockSpec((1, D), lambda i, f: (0, 0)),
                  pl.BlockSpec((1, D), lambda i, f: (0, 0)),
                  pl.BlockSpec((1, D), lambda i, f: (0, 0))],
        out_specs=pl.BlockSpec((tm, D), lambda i, f: (i, 0)),
        scratch_shapes=[pltpu.VMEM((tm, D), jnp.float32)],
        compiler_params=pltpu.CompilerParams(
            dimension_semantics=("parallel", "arbitrary"),
            vmem_limit_bytes=_vmem_limit(blk_bytes)),
    )(x, lp["ff1_w"], lp["ff1_b"].reshape(1, F), lp["ff2_w"],
      lp["ff2_b"].reshape(1, D), lp["ln2_g"].reshape(1, D),
      lp["ln2_b"].reshape(1, D))


# ------------------------------------------------------------------- params --

def init_params(key, input_dim, seq_len, model_dim, num_heads, ff_dim, num_layers):
    hd = model_dim // num_heads
    keys = jax.random.split(key, 2 + num_layers)

    def dense(k, fan_in, shape):
        # layout == PyTorch weight.T (in_features leading), bf16 for the MXU
        w = jax.random.normal(k, shape, jnp.float32) / jnp.sqrt(jnp.float32(fan_in))
        return w.astype(jnp.bfloat16)

    params = {
        "proj_w": dense(keys[0], input_dim, (input_dim, model_dim)),
        "proj_b": 0.02 * jax.random.normal(keys[1], (model_dim,), jnp.float32),
        # nn.Parameter(torch.zeros(1, seq_len, model_dim)): zeros at init; the fused
        # add supports any (trained) value.
        "pos": jnp.zeros((seq_len, model_dim), jnp.float32),
        "layers": [],
    }
    D, F, H = model_dim, ff_dim, num_heads
    for i in range(num_layers):
        lk = jax.random.split(keys[2 + i], 12)
        params["layers"].append({
            # in_proj weight split per head, head-major (H, D, hd) == weight.T reshaped
            "wq": dense(lk[0], D, (H, D, hd)),
            "wk": dense(lk[1], D, (H, D, hd)),
            "wv": dense(lk[2], D, (H, D, hd)),
            "bq": 0.02 * jax.random.normal(lk[3], (H, 1, hd), jnp.float32),
            "bk": 0.02 * jax.random.normal(lk[4], (H, 1, hd), jnp.float32),
            "bv": 0.02 * jax.random.normal(lk[5], (H, 1, hd), jnp.float32),
            # out_proj weight.T reshaped to (H, hd, D); bias (1, D)
            "wo": dense(lk[6], D, (H, hd, D)),
            "bo": 0.02 * jax.random.normal(lk[7], (1, D), jnp.float32),
            "ff1_w": dense(lk[8], D, (D, F)),
            "ff1_b": 0.02 * jax.random.normal(lk[9], (F,), jnp.float32),
            "ff2_w": dense(lk[10], F, (F, D)),
            "ff2_b": 0.02 * jax.random.normal(lk[11], (D,), jnp.float32),
            "ln1_g": jnp.ones((D,), jnp.float32),
            "ln1_b": jnp.zeros((D,), jnp.float32),
            "ln2_g": jnp.ones((D,), jnp.float32),
            "ln2_b": jnp.zeros((D,), jnp.float32),
        })
    return params


# ------------------------------------------------------------------ forward --

def transformer_forward(params, x, num_heads):
    """x: (B, S, input_dim) -> (B, S, model_dim). Eval mode (dropout = identity)."""
    B, S, _ = x.shape
    D = params["proj_w"].shape[1]
    hd = D // num_heads
    scale = 1.0 / float(hd) ** 0.5

    h = input_projection(x, params["proj_w"], params["proj_b"], params["pos"])
    for lp in params["layers"]:
        h = attention_block(h, lp, num_heads=num_heads, scale=scale)
        h = ffn_block(h.reshape(B * S, D), lp).reshape(B, S, D)
    # TODO(synk): nn.Dropout layers are identity in eval mode; stochastic dropout not emitted.
    return h.astype(jnp.float32)


# --------------------------------------------------------- pure-JAX reference --

def _layernorm_ref(z, g, b, eps=1e-5):
    mean = jnp.mean(z, axis=-1, keepdims=True)
    var = jnp.mean((z - mean) ** 2, axis=-1, keepdims=True)
    return (z - mean) * lax.rsqrt(var + eps) * g + b


def reference_forward(params, x, num_heads, eps=1e-5):
    f = lambda a: jnp.asarray(a, jnp.float32)
    D = params["proj_w"].shape[1]
    hd = D // num_heads
    scale = 1.0 / float(hd) ** 0.5

    h = jnp.einsum("bsi,id->bsd", f(x), f(params["proj_w"])) + f(params["proj_b"])
    h = h + f(params["pos"])[None]
    for lp in params["layers"]:
        q = jnp.einsum("bsd,hdk->bhsk", h, f(lp["wq"])) + f(lp["bq"])[None]
        k = jnp.einsum("bsd,hdk->bhsk", h, f(lp["wk"])) + f(lp["bk"])[None]
        v = jnp.einsum("bsd,hdk->bhsk", h, f(lp["wv"])) + f(lp["bv"])[None]
        s = jnp.einsum("bhqk,bhsk->bhqs", q * scale, k)
        p = jax.nn.softmax(s, axis=-1)
        o = jnp.einsum("bhqs,bhsk->bhqk", p, v)
        attn = jnp.einsum("bhqk,hkd->bqd", o, f(lp["wo"])) + f(lp["bo"])[None]
        h = _layernorm_ref(h + attn, f(lp["ln1_g"]), f(lp["ln1_b"]), eps)
        ff = jnp.maximum(jnp.einsum("bsd,df->bsf", h, f(lp["ff1_w"]))
                         + f(lp["ff1_b"]), 0.0)
        ff = jnp.einsum("bsf,fd->bsd", ff, f(lp["ff2_w"])) + f(lp["ff2_b"])
        h = _layernorm_ref(h + ff, f(lp["ln2_g"]), f(lp["ln2_b"]), eps)
    return h


# --------------------------------------------------------------------- main --

if __name__ == "__main__":
    B, S = 2, 8
    INPUT_DIM, MODEL_DIM, NUM_HEADS, FF_DIM, NUM_LAYERS = 16, 32, 4, 64, 2

    key = jax.random.PRNGKey(0)
    kx, kp = jax.random.split(key)
    x = jax.random.normal(kx, (B, S, INPUT_DIM), jnp.float32)
    params = init_params(kp, INPUT_DIM, S, MODEL_DIM, NUM_HEADS, FF_DIM, NUM_LAYERS)

    fwd = jax.jit(functools.partial(transformer_forward, num_heads=NUM_HEADS))
    out = jax.block_until_ready(fwd(params, x))

    assert out.shape == (B, S, MODEL_DIM), out.shape
    assert bool(jnp.all(jnp.isfinite(out)))

    # Pure-JAX f32 reference with the same parameters; bf16 MXU matmuls and the
    # approximate softmax reciprocal keep the kernel within a few 1e-2 of it.
    ref = reference_forward(params, x, NUM_HEADS)
    max_err = float(jnp.max(jnp.abs(out - ref)))
    assert max_err < 0.1, f"max abs err vs reference: {max_err}"
    print("KERNEL_OK")
</pallas_src>

<mosaic_0001>
module attributes {stable_mosaic.version = 11 : i64} {
  func.func @_attn_block_kernel(%arg0: i32, %arg1: i32, %arg2: i32, %arg3: memref<1x8x32xbf16, #tpu.memory_space<vmem>>, %arg4: memref<1x8x32xbf16, #tpu.memory_space<vmem>>, %arg5: memref<1x32x8xbf16, #tpu.memory_space<vmem>>, %arg6: memref<1x32x8xbf16, #tpu.memory_space<vmem>>, %arg7: memref<1x32x8xbf16, #tpu.memory_space<vmem>>, %arg8: memref<1x1x8xf32, #tpu.memory_space<vmem>>, %arg9: memref<1x1x8xf32, #tpu.memory_space<vmem>>, %arg10: memref<1x1x8xf32, #tpu.memory_space<vmem>>, %arg11: memref<1x8x32xbf16, #tpu.memory_space<vmem>>, %arg12: memref<1x32xf32, #tpu.memory_space<vmem>>, %arg13: memref<1x32xf32, #tpu.memory_space<vmem>>, %arg14: memref<1x32xf32, #tpu.memory_space<vmem>>, %arg15: memref<1x8x32xbf16, #tpu.memory_space<vmem>>, %arg16: memref<8x32xf32, #tpu.memory_space<vmem>>) attributes {dimension_semantics = [#tpu.dimension_semantics<parallel>, #tpu.dimension_semantics<parallel>, #tpu.dimension_semantics<arbitrary>], iteration_bounds = array<i64: 2, 1, 4>, scalar_prefetch = 0 : i64, scratch_operands = 1 : i64, tpu.core_type = #tpu.core_type<tc>, window_params = [{transform_indices = @transform_0, window_bounds = array<i64: 1, 8, 32>}, {transform_indices = @transform_1, window_bounds = array<i64: 1, 8, 32>}, {transform_indices = @transform_2, window_bounds = array<i64: 1, 32, 8>}, {transform_indices = @transform_3, window_bounds = array<i64: 1, 32, 8>}, {transform_indices = @transform_4, window_bounds = array<i64: 1, 32, 8>}, {transform_indices = @transform_5, window_bounds = array<i64: 1, 1, 8>}, {transform_indices = @transform_6, window_bounds = array<i64: 1, 1, 8>}, {transform_indices = @transform_7, window_bounds = array<i64: 1, 1, 8>}, {transform_indices = @transform_8, window_bounds = array<i64: 1, 8, 32>}, {pipeline_mode = #tpu.pipeline_mode<synchronous>, transform_indices = @transform_9, window_bounds = array<i64: 1, 32>}, {pipeline_mode = #tpu.pipeline_mode<synchronous>, transform_indices = @transform_10, window_bounds = array<i64: 1, 32>}, {pipeline_mode = #tpu.pipeline_mode<synchronous>, transform_indices = @transform_11, window_bounds = array<i64: 1, 32>}, {transform_indices = @transform_12, window_bounds = array<i64: 1, 8, 32>}]} {
    %c0_i32 = arith.constant 0 : i32
    %0 = arith.cmpi eq, %arg2, %c0_i32 : i32
    %1 = arith.extui %0 : i1 to i32
    %c0_i32_0 = arith.constant 0 : i32
    %2 = arith.cmpi ne, %1, %c0_i32_0 : i32
    scf.if %2 {
      %cst_40 = arith.constant 0.000000e+00 : f32
      %56 = vector.broadcast %cst_40 : f32 to vector<8x32xf32>
      %c0_41 = arith.constant 0 : index
      %c0_42 = arith.constant 0 : index
      %57 = vector.load %arg16[%c0_41, %c0_42] : memref<8x32xf32, #tpu.memory_space<vmem>>, vector<8x32xf32>
      tpu.vector_store %arg16[%c0_41, %c0_42], %56 {strides = array<i32>} : memref<8x32xf32, #tpu.memory_space<vmem>>, vector<8x32xf32>,
    } else {
    }
    %c0 = arith.constant 0 : index
    %c0_1 = arith.constant 0 : index
    %c0_2 = arith.constant 0 : index
    %3 = vector.load %arg3[%c0, %c0_1, %c0_2] : memref<1x8x32xbf16, #tpu.memory_space<vmem>>, vector<1x8x32xbf16>
    %4 = vector.shape_cast %3 : vector<1x8x32xbf16> to vector<8x32xbf16>
    %c0_3 = arith.constant 0 : index
    %c0_4 = arith.constant 0 : index
    %c0_5 = arith.constant 0 : index
    %5 = vector.load %arg4[%c0_3, %c0_4, %c0_5] : memref<1x8x32xbf16, #tpu.memory_space<vmem>>, vector<1x8x32xbf16>
    %6 = vector.shape_cast %5 : vector<1x8x32xbf16> to vector<8x32xbf16>
    %c0_6 = arith.constant 0 : index
    %c0_7 = arith.constant 0 : index
    %c0_8 = arith.constant 0 : index
    %7 = vector.load %arg5[%c0_6, %c0_7, %c0_8] : memref<1x32x8xbf16, #tpu.memory_space<vmem>>, vector<1x32x8xbf16>
    %8 = vector.shape_cast %7 : vector<1x32x8xbf16> to vector<32x8xbf16>
    %cst = arith.constant dense<0.000000e+00> : vector<8x8xf32>
    %9 = tpu.matmul %6, %8, %cst {dimension_numbers = #tpu.dot_dimension_numbers<[1], [0], [0], [1], [0, 0, 1, 1], [], []>} : vector<8x32xbf16>, vector<32x8xbf16>, vector<8x8xf32> -> vector<8x8xf32>
    %c0_9 = arith.constant 0 : index
    %c0_10 = arith.constant 0 : index
    %c0_11 = arith.constant 0 : index
    %10 = vector.load %arg8[%c0_9, %c0_10, %c0_11] : memref<1x1x8xf32, #tpu.memory_space<vmem>>, vector<1x1x8xf32>
    %11 = vector.shape_cast %10 : vector<1x1x8xf32> to vector<1x8xf32>
    %12 = vector.broadcast %11 : vector<1x8xf32> to vector<8x8xf32>
    %13 = arith.addf %9, %12 : vector<8x8xf32>
    %c0_12 = arith.constant 0 : index
    %c0_13 = arith.constant 0 : index
    %c0_14 = arith.constant 0 : index
    %14 = vector.load %arg6[%c0_12, %c0_13, %c0_14] : memref<1x32x8xbf16, #tpu.memory_space<vmem>>, vector<1x32x8xbf16>
    %15 = vector.shape_cast %14 : vector<1x32x8xbf16> to vector<32x8xbf16>
    %cst_15 = arith.constant dense<0.000000e+00> : vector<8x8xf32>
    %16 = tpu.matmul %4, %15, %cst_15 {dimension_numbers = #tpu.dot_dimension_numbers<[1], [0], [0], [1], [0, 0, 1, 1], [], []>} : vector<8x32xbf16>, vector<32x8xbf16>, vector<8x8xf32> -> vector<8x8xf32>
    %c0_16 = arith.constant 0 : index
    %c0_17 = arith.constant 0 : index
    %c0_18 = arith.constant 0 : index
    %17 = vector.load %arg9[%c0_16, %c0_17, %c0_18] : memref<1x1x8xf32, #tpu.memory_space<vmem>>, vector<1x1x8xf32>
    %18 = vector.shape_cast %17 : vector<1x1x8xf32> to vector<1x8xf32>
    %19 = vector.broadcast %18 : vector<1x8xf32> to vector<8x8xf32>
    %20 = arith.addf %16, %19 : vector<8x8xf32>
    %c0_19 = arith.constant 0 : index
    %c0_20 = arith.constant 0 : index
    %c0_21 = arith.constant 0 : index
    %21 = vector.load %arg7[%c0_19, %c0_20, %c0_21] : memref<1x32x8xbf16, #tpu.memory_space<vmem>>, vector<1x32x8xbf16>
    %22 = vector.shape_cast %21 : vector<1x32x8xbf16> to vector<32x8xbf16>
    %cst_22 = arith.constant dense<0.000000e+00> : vector<8x8xf32>
    %23 = tpu.matmul %4, %22, %cst_22 {dimension_numbers = #tpu.dot_dimension_numbers<[1], [0], [0], [1], [0, 0, 1, 1], [], []>} : vector<8x32xbf16>, vector<32x8xbf16>, vector<8x8xf32> -> vector<8x8xf32>
    %c0_23 = arith.constant 0 : index
    %c0_24 = arith.constant 0 : index
    %c0_25 = arith.constant 0 : index
    %24 = vector.load %arg10[%c0_23, %c0_24, %c0_25] : memref<1x1x8xf32, #tpu.memory_space<vmem>>, vector<1x1x8xf32>
    %25 = vector.shape_cast %24 : vector<1x1x8xf32> to vector<1x8xf32>
    %26 = vector.broadcast %25 : vector<1x8xf32> to vector<8x8xf32>
    %27 = arith.addf %23, %26 : vector<8x8xf32>
    %cst_26 = arith.constant 0.353553385 : f32
    %28 = vector.broadcast %cst_26 : f32 to vector<8x8xf32>
    %29 = arith.mulf %13, %28 : vector<8x8xf32>
    %30 = arith.truncf %29 : vector<8x8xf32> to vector<8x8xbf16>
    %31 = arith.truncf %20 : vector<8x8xf32> to vector<8x8xbf16>
    %cst_27 = arith.constant dense<0.000000e+00> : vector<8x8xf32>
    %32 = tpu.matmul %30, %31, %cst_27 {dimension_numbers = #tpu.dot_dimension_numbers<[1], [1], [0], [0], [0, 0, 1, 0], [], []>} : vector<8x8xbf16>, vector<8x8xbf16>, vector<8x8xf32> -> vector<8x8xf32>
    %cst_28 = arith.constant dense<0xFF800000> : vector<8xf32>
    %33 = vector.multi_reduction <maximumf>, %32, %cst_28 [1] : vector<8x8xf32> to vector<8xf32>
    %34 = vector.shape_cast %33 : vector<8xf32> to vector<8x1xf32>
    %35 = vector.broadcast %34 : vector<8x1xf32> to vector<8x8xf32>
    %36 = arith.subf %32, %35 : vector<8x8xf32>
    %37 = math.exp %36 : vector<8x8xf32>
    %cst_29 = arith.constant dense<0.000000e+00> : vector<8xf32>
    %38 = vector.multi_reduction <add>, %37, %cst_29 [1] : vector<8x8xf32> to vector<8xf32>
    %39 = vector.shape_cast %38 : vector<8xf32> to vector<8x1xf32>
    %40 = tpu.reciprocal %39 {approx = true} : vector<8x1xf32> -> vector<8x1xf32>
    %41 = vector.broadcast %40 : vector<8x1xf32> to vector<8x8xf32>
    %42 = arith.mulf %37, %41 : vector<8x8xf32>
    %43 = arith.truncf %42 : vector<8x8xf32> to vector<8x8xbf16>
    %44 = arith.truncf %27 : vector<8x8xf32> to vector<8x8xbf16>
    %cst_30 = arith.constant dense<0.000000e+00> : vector<8x8xf32>
    %45 = tpu.matmul %43, %44, %cst_30 {dimension_numbers = #tpu.dot_dimension_numbers<[1], [0], [0], [1], [0, 0, 1, 1], [], []>} : vector<8x8xbf16>, vector<8x8xbf16>, vector<8x8xf32> -> vector<8x8xf32>
    %c0_31 = arith.constant 0 : index
    %c0_32 = arith.constant 0 : index
    %46 = vector.load %arg16[%c0_31, %c0_32] : memref<8x32xf32, #tpu.memory_space<vmem>>, vector<8x32xf32>
    %47 = arith.truncf %45 : vector<8x8xf32> to vector<8x8xbf16>
    %c0_33 = arith.constant 0 : index
    %c0_34 = arith.constant 0 : index
    %c0_35 = arith.constant 0 : index
    %48 = vector.load %arg11[%c0_33, %c0_34, %c0_35] : memref<1x8x32xbf16, #tpu.memory_space<vmem>>, vector<1x8x32xbf16>
    %49 = vector.shape_cast %48 : vector<1x8x32xbf16> to vector<8x32xbf16>
    %cst_36 = arith.constant dense<0.000000e+00> : vector<8x32xf32>
    %50 = tpu.matmul %47, %49, %cst_36 {dimension_numbers = #tpu.dot_dimension_numbers<[1], [0], [0], [1], [0, 0, 1, 1], [], []>} : vector<8x8xbf16>, vector<8x32xbf16>, vector<8x32xf32> -> vector<8x32xf32>
    %51 = arith.addf %46, %50 : vector<8x32xf32>
    %c0_37 = arith.constant 0 : index
    %c0_38 = arith.constant 0 : index
    %52 = vector.load %arg16[%c0_37, %c0_38] : memref<8x32xf32, #tpu.memory_space<vmem>>, vector<8x32xf32>
    tpu.vector_store %arg16[%c0_37, %c0_38], %51 {strides = array<i32>} : memref<8x32xf32, #tpu.memory_space<vmem>>, vector<8x32xf32>,
    %c3_i32 = arith.constant 3 : i32
    %53 = arith.cmpi eq, %arg2, %c3_i32 : i32
    %54 = arith.extui %53 : i1 to i32
    %c0_i32_39 = arith.constant 0 : i32
    %55 = arith.cmpi ne, %54, %c0_i32_39 : i32
    scf.if %55 {
      %c0_40 = arith.constant 0 : index
      %c0_41 = arith.constant 0 : index
      %56 = vector.load %arg16[%c0_40, %c0_41] : memref<8x32xf32, #tpu.memory_space<vmem>>, vector<8x32xf32>
      %c0_42 = arith.constant 0 : index
      %c0_43 = arith.constant 0 : index
      %57 = vector.load %arg12[%c0_42, %c0_43] : memref<1x32xf32, #tpu.memory_space<vmem>>, vector<1x32xf32>
      %58 = vector.broadcast %57 : vector<1x32xf32> to vector<8x32xf32>
      %59 = arith.addf %56, %58 : vector<8x32xf32>
      %60 = arith.extf %6 : vector<8x32xbf16> to vector<8x32xf32>
      %61 = arith.addf %59, %60 : vector<8x32xf32>
      %cst_44 = arith.constant dense<0.000000e+00> : vector<8xf32>
      %62 = vector.multi_reduction <add>, %61, %cst_44 [1] : vector<8x32xf32> to vector<8xf32>
      %63 = vector.shape_cast %62 : vector<8xf32> to vector<8x1xf32>
      %cst_45 = arith.constant 3.200000e+01 : f32
      %64 = vector.broadcast %cst_45 : f32 to vector<8x1xf32>
      %65 = arith.divf %63, %64 : vector<8x1xf32>
      %66 = vector.broadcast %65 : vector<8x1xf32> to vector<8x32xf32>
      %67 = arith.subf %61, %66 : vector<8x32xf32>
      %68 = arith.mulf %67, %67 : vector<8x32xf32>
      %cst_46 = arith.constant dense<0.000000e+00> : vector<8xf32>
      %69 = vector.multi_reduction <add>, %68, %cst_46 [1] : vector<8x32xf32> to vector<8xf32>
      %70 = vector.shape_cast %69 : vector<8xf32> to vector<8x1xf32>
      %cst_47 = arith.constant 3.200000e+01 : f32
      %71 = vector.broadcast %cst_47 : f32 to vector<8x1xf32>
      %72 = arith.divf %70, %71 : vector<8x1xf32>
      %cst_48 = arith.constant 9.99999974E-6 : f32
      %73 = vector.broadcast %cst_48 : f32 to vector<8x1xf32>
      %74 = arith.addf %72, %73 : vector<8x1xf32>
      %75 = math.rsqrt %74 : vector<8x1xf32>
      %76 = vector.broadcast %75 : vector<8x1xf32> to vector<8x32xf32>
      %77 = arith.mulf %67, %76 : vector<8x32xf32>
      %c0_49 = arith.constant 0 : index
      %c0_50 = arith.constant 0 : index
      %78 = vector.load %arg13[%c0_49, %c0_50] : memref<1x32xf32, #tpu.memory_space<vmem>>, vector<1x32xf32>
      %79 = vector.broadcast %78 : vector<1x32xf32> to vector<8x32xf32>
      %80 = arith.mulf %77, %79 : vector<8x32xf32>
      %c0_51 = arith.constant 0 : index
      %c0_52 = arith.constant 0 : index
      %81 = vector.load %arg14[%c0_51, %c0_52] : memref<1x32xf32, #tpu.memory_space<vmem>>, vector<1x32xf32>
      %82 = vector.broadcast %81 : vector<1x32xf32> to vector<8x32xf32>
      %83 = arith.addf %80, %82 : vector<8x32xf32>
      %84 = arith.truncf %83 : vector<8x32xf32> to vector<8x32xbf16>
      %c0_53 = arith.constant 0 : index
      %c0_54 = arith.constant 0 : index
      %c0_55 = arith.constant 0 : index
      %85 = vector.load %arg15[%c0_53, %c0_54, %c0_55] : memref<1x8x32xbf16, #tpu.memory_space<vmem>>, vector<1x8x32xbf16>
      %86 = vector.shape_cast %85 : vector<1x8x32xbf16> to vector<8x32xbf16>
      %87 = vector.shape_cast %84 : vector<8x32xbf16> to vector<1x8x32xbf16>
      tpu.vector_store %arg15[%c0_53, %c0_54, %c0_55], %87 {strides = array<i32>} : memref<1x8x32xbf16, #tpu.memory_space<vmem>>, vector<1x8x32xbf16>,
    } else {
    }
    return
  }
  func.func @transform_0(%arg0: i32, %arg1: i32, %arg2: i32) -> (i32, i32, i32) {
    %c0_i32 = arith.constant 0 : i32
    %c0_i32_0 = arith.constant 0 : i32
    %c0_i32_1 = arith.constant 0 : i32
    return %arg0, %c0_i32, %c0_i32_0 : i32, i32, i32
  }
  func.func @transform_1(%arg0: i32, %arg1: i32, %arg2: i32) -> (i32, i32, i32) {
    %c0_i32 = arith.constant 0 : i32
    %c0_i32_0 = arith.constant 0 : i32
    return %arg0, %arg1, %c0_i32 : i32, i32, i32
  }
  func.func @transform_2(%arg0: i32, %arg1: i32, %arg2: i32) -> (i32, i32, i32) {
    %c0_i32 = arith.constant 0 : i32
    %c0_i32_0 = arith.constant 0 : i32
    %c0_i32_1 = arith.constant 0 : i32
    return %arg2, %c0_i32, %c0_i32_0 : i32, i32, i32
  }
  func.func @transform_3(%arg0: i32, %arg1: i32, %arg2: i32) -> (i32, i32, i32) {
    %c0_i32 = arith.constant 0 : i32
    %c0_i32_0 = arith.constant 0 : i32
    %c0_i32_1 = arith.constant 0 : i32
    return %arg2, %c0_i32, %c0_i32_0 : i32, i32, i32
  }
  func.func @transform_4(%arg0: i32, %arg1: i32, %arg2: i32) -> (i32, i32, i32) {
    %c0_i32 = arith.constant 0 : i32
    %c0_i32_0 = arith.constant 0 : i32
    %c0_i32_1 = arith.constant 0 : i32
    return %arg2, %c0_i32, %c0_i32_0 : i32, i32, i32
  }
  func.func @transform_5(%arg0: i32, %arg1: i32, %arg2: i32) -> (i32, i32, i32) {
    %c0_i32 = arith.constant 0 : i32
    %c0_i32_0 = arith.constant 0 : i32
    %c0_i32_1 = arith.constant 0 : i32
    return %arg2, %c0_i32, %c0_i32_0 : i32, i32, i32
  }
  func.func @transform_6(%arg0: i32, %arg1: i32, %arg2: i32) -> (i32, i32, i32) {
    %c0_i32 = arith.constant 0 : i32
    %c0_i32_0 = arith.constant 0 : i32
    %c0_i32_1 = arith.constant 0 : i32
    return %arg2, %c0_i32, %c0_i32_0 : i32, i32, i32
  }
  func.func @transform_7(%arg0: i32, %arg1: i32, %arg2: i32) -> (i32, i32, i32) {
    %c0_i32 = arith.constant 0 : i32
    %c0_i32_0 = arith.constant 0 : i32
    %c0_i32_1 = arith.constant 0 : i32
    return %arg2, %c0_i32, %c0_i32_0 : i32, i32, i32
  }
  func.func @transform_8(%arg0: i32, %arg1: i32, %arg2: i32) -> (i32, i32, i32) {
    %c0_i32 = arith.constant 0 : i32
    %c0_i32_0 = arith.constant 0 : i32
    %c0_i32_1 = arith.constant 0 : i32
    return %arg2, %c0_i32, %c0_i32_0 : i32, i32, i32
  }
  func.func @transform_9(%arg0: i32, %arg1: i32, %arg2: i32) -> (i32, i32) {
    %c0_i32 = arith.constant 0 : i32
    %c0_i32_0 = arith.constant 0 : i32
    %c0_i32_1 = arith.constant 0 : i32
    return %c0_i32, %c0_i32_0 : i32, i32
  }
  func.func @transform_10(%arg0: i32, %arg1: i32, %arg2: i32) -> (i32, i32) {
    %c0_i32 = arith.constant 0 : i32
    %c0_i32_0 = arith.constant 0 : i32
    %c0_i32_1 = arith.constant 0 : i32
    return %c0_i32, %c0_i32_0 : i32, i32
  }
  func.func @transform_11(%arg0: i32, %arg1: i32, %arg2: i32) -> (i32, i32) {
    %c0_i32 = arith.constant 0 : i32
    %c0_i32_0 = arith.constant 0 : i32
    %c0_i32_1 = arith.constant 0 : i32
    return %c0_i32, %c0_i32_0 : i32, i32
  }
  func.func @transform_12(%arg0: i32, %arg1: i32, %arg2: i32) -> (i32, i32, i32) {
    %c0_i32 = arith.constant 0 : i32
    %c0_i32_0 = arith.constant 0 : i32
    return %arg0, %arg1, %c0_i32 : i32, i32, i32
  }
}

module attributes {stable_mosaic.version = 11 : i64} {
  func.func @_inproj_kernel(%arg0: i32, %arg1: i32, %arg2: i32, %arg3: memref<1x8x16xbf16, #tpu.memory_space<vmem>>, %arg4: memref<16x32xbf16, #tpu.memory_space<vmem>>, %arg5: memref<1x32xf32, #tpu.memory_space<vmem>>, %arg6: memref<8x32xf32, #tpu.memory_space<vmem>>, %arg7: memref<1x8x32xbf16, #tpu.memory_space<vmem>>, %arg8: memref<8x32xf32, #tpu.memory_space<vmem>>) attributes {dimension_semantics = [#tpu.dimension_semantics<parallel>, #tpu.dimension_semantics<parallel>, #tpu.dimension_semantics<arbitrary>], iteration_bounds = array<i64: 2, 1, 1>, scalar_prefetch = 0 : i64, scratch_operands = 1 : i64, tpu.core_type = #tpu.core_type<tc>, window_params = [{transform_indices = @transform_0, window_bounds = array<i64: 1, 8, 16>}, {transform_indices = @transform_1, window_bounds = array<i64: 16, 32>}, {transform_indices = @transform_2, window_bounds = array<i64: 1, 32>}, {transform_indices = @transform_3, window_bounds = array<i64: 8, 32>}, {transform_indices = @transform_4, window_bounds = array<i64: 1, 8, 32>}]} {
    %c0_i32 = arith.constant 0 : i32
    %0 = arith.cmpi eq, %arg2, %c0_i32 : i32
    %1 = arith.extui %0 : i1 to i32
    %c0_i32_0 = arith.constant 0 : i32
    %2 = arith.cmpi ne, %1, %c0_i32_0 : i32
    scf.if %2 {
      %cst_11 = arith.constant 0.000000e+00 : f32
      %13 = vector.broadcast %cst_11 : f32 to vector<8x32xf32>
      %c0_12 = arith.constant 0 : index
      %c0_13 = arith.constant 0 : index
      %14 = vector.load %arg8[%c0_12, %c0_13] : memref<8x32xf32, #tpu.memory_space<vmem>>, vector<8x32xf32>
      tpu.vector_store %arg8[%c0_12, %c0_13], %13 {strides = array<i32>} : memref<8x32xf32, #tpu.memory_space<vmem>>, vector<8x32xf32>,
    } else {
    }
    %c0 = arith.constant 0 : index
    %c0_1 = arith.constant 0 : index
    %3 = vector.load %arg8[%c0, %c0_1] : memref<8x32xf32, #tpu.memory_space<vmem>>, vector<8x32xf32>
    %c0_2 = arith.constant 0 : index
    %c0_3 = arith.constant 0 : index
    %c0_4 = arith.constant 0 : index
    %4 = vector.load %arg3[%c0_2, %c0_3, %c0_4] : memref<1x8x16xbf16, #tpu.memory_space<vmem>>, vector<1x8x16xbf16>
    %5 = vector.shape_cast %4 : vector<1x8x16xbf16> to vector<8x16xbf16>
    %c0_5 = arith.constant 0 : index
    %c0_6 = arith.constant 0 : index
    %6 = vector.load %arg4[%c0_5, %c0_6] : memref<16x32xbf16, #tpu.memory_space<vmem>>, vector<16x32xbf16>
    %cst = arith.constant dense<0.000000e+00> : vector<8x32xf32>
    %7 = tpu.matmul %5, %6, %cst {dimension_numbers = #tpu.dot_dimension_numbers<[1], [0], [0], [1], [0, 0, 1, 1], [], []>} : vector<8x16xbf16>, vector<16x32xbf16>, vector<8x32xf32> -> vector<8x32xf32>
    %8 = arith.addf %3, %7 : vector<8x32xf32>
    %c0_7 = arith.constant 0 : index
    %c0_8 = arith.constant 0 : index
    %9 = vector.load %arg8[%c0_7, %c0_8] : memref<8x32xf32, #tpu.memory_space<vmem>>, vector<8x32xf32>
    tpu.vector_store %arg8[%c0_7, %c0_8], %8 {strides = array<i32>} : memref<8x32xf32, #tpu.memory_space<vmem>>, vector<8x32xf32>,
    %c0_i32_9 = arith.constant 0 : i32
    %10 = arith.cmpi eq, %arg2, %c0_i32_9 : i32
    %11 = arith.extui %10 : i1 to i32
    %c0_i32_10 = arith.constant 0 : i32
    %12 = arith.cmpi ne, %11, %c0_i32_10 : i32
    scf.if %12 {
      %c0_11 = arith.constant 0 : index
      %c0_12 = arith.constant 0 : index
      %13 = vector.load %arg8[%c0_11, %c0_12] : memref<8x32xf32, #tpu.memory_space<vmem>>, vector<8x32xf32>
      %c0_13 = arith.constant 0 : index
      %c0_14 = arith.constant 0 : index
      %14 = vector.load %arg5[%c0_13, %c0_14] : memref<1x32xf32, #tpu.memory_space<vmem>>, vector<1x32xf32>
      %15 = vector.broadcast %14 : vector<1x32xf32> to vector<8x32xf32>
      %16 = arith.addf %13, %15 : vector<8x32xf32>
      %c0_15 = arith.constant 0 : index
      %c0_16 = arith.constant 0 : index
      %17 = vector.load %arg6[%c0_15, %c0_16] : memref<8x32xf32, #tpu.memory_space<vmem>>, vector<8x32xf32>
      %18 = arith.addf %16, %17 : vector<8x32xf32>
      %19 = arith.truncf %18 : vector<8x32xf32> to vector<8x32xbf16>
      %c0_17 = arith.constant 0 : index
      %c0_18 = arith.constant 0 : index
      %c0_19 = arith.constant 0 : index
      %20 = vector.load %arg7[%c0_17, %c0_18, %c0_19] : memref<1x8x32xbf16, #tpu.memory_space<vmem>>, vector<1x8x32xbf16>
      %21 = vector.shape_cast %20 : vector<1x8x32xbf16> to vector<8x32xbf16>
      %22 = vector.shape_cast %19 : vector<8x32xbf16> to vector<1x8x32xbf16>
      tpu.vector_store %arg7[%c0_17, %c0_18, %c0_19], %22 {strides = array<i32>} : memref<1x8x32xbf16, #tpu.memory_space<vmem>>, vector<1x8x32xbf16>,
    } else {
    }
    return
  }
  func.func @transform_0(%arg0: i32, %arg1: i32, %arg2: i32) -> (i32, i32, i32) {
    %c0_i32 = arith.constant 0 : i32
    %c0_i32_0 = arith.constant 0 : i32
    return %arg0, %c0_i32, %arg2 : i32, i32, i32
  }
  func.func @transform_1(%arg0: i32, %arg1: i32, %arg2: i32) -> (i32, i32) {
    %c0_i32 = arith.constant 0 : i32
    return %arg2, %arg1 : i32, i32
  }
  func.func @transform_2(%arg0: i32, %arg1: i32, %arg2: i32) -> (i32, i32) {
    %c0_i32 = arith.constant 0 : i32
    %c0_i32_0 = arith.constant 0 : i32
    return %c0_i32, %arg1 : i32, i32
  }
  func.func @transform_3(%arg0: i32, %arg1: i32, %arg2: i32) -> (i32, i32) {
    %c0_i32 = arith.constant 0 : i32
    %c0_i32_0 = arith.constant 0 : i32
    return %c0_i32, %arg1 : i32, i32
  }
  func.func @transform_4(%arg0: i32, %arg1: i32, %arg2: i32) -> (i32, i32, i32) {
    %c0_i32 = arith.constant 0 : i32
    %c0_i32_0 = arith.constant 0 : i32
    return %arg0, %c0_i32, %arg1 : i32, i32, i32
  }
}

module attributes {stable_mosaic.version = 11 : i64} {
  func.func @_ffn_kernel(%arg0: i32, %arg1: i32, %arg2: memref<16x32xbf16, #tpu.memory_space<vmem>>, %arg3: memref<32x64xbf16, #tpu.memory_space<vmem>>, %arg4: memref<1x64xf32, #tpu.memory_space<vmem>>, %arg5: memref<64x32xbf16, #tpu.memory_space<vmem>>, %arg6: memref<1x32xf32, #tpu.memory_space<vmem>>, %arg7: memref<1x32xf32, #tpu.memory_space<vmem>>, %arg8: memref<1x32xf32, #tpu.memory_space<vmem>>, %arg9: memref<16x32xbf16, #tpu.memory_space<vmem>>, %arg10: memref<16x32xf32, #tpu.memory_space<vmem>>) attributes {dimension_semantics = [#tpu.dimension_semantics<parallel>, #tpu.dimension_semantics<arbitrary>], iteration_bounds = array<i64: 1, 1>, scalar_prefetch = 0 : i64, scratch_operands = 1 : i64, tpu.core_type = #tpu.core_type<tc>, window_params = [{transform_indices = @transform_0, window_bounds = array<i64: 16, 32>}, {transform_indices = @transform_1, window_bounds = array<i64: 32, 64>}, {transform_indices = @transform_2, window_bounds = array<i64: 1, 64>}, {transform_indices = @transform_3, window_bounds = array<i64: 64, 32>}, {pipeline_mode = #tpu.pipeline_mode<synchronous>, transform_indices = @transform_4, window_bounds = array<i64: 1, 32>}, {pipeline_mode = #tpu.pipeline_mode<synchronous>, transform_indices = @transform_5, window_bounds = array<i64: 1, 32>}, {pipeline_mode = #tpu.pipeline_mode<synchronous>, transform_indices = @transform_6, window_bounds = array<i64: 1, 32>}, {transform_indices = @transform_7, window_bounds = array<i64: 16, 32>}]} {
    %c0_i32 = arith.constant 0 : i32
    %0 = arith.cmpi eq, %arg1, %c0_i32 : i32
    %1 = arith.extui %0 : i1 to i32
    %c0_i32_0 = arith.constant 0 : i32
    %2 = arith.cmpi ne, %1, %c0_i32_0 : i32
    scf.if %2 {
      %cst_16 = arith.constant 0.000000e+00 : f32
      %20 = vector.broadcast %cst_16 : f32 to vector<16x32xf32>
      %c0_17 = arith.constant 0 : index
      %c0_18 = arith.constant 0 : index
      %21 = vector.load %arg10[%c0_17, %c0_18] : memref<16x32xf32, #tpu.memory_space<vmem>>, vector<16x32xf32>
      tpu.vector_store %arg10[%c0_17, %c0_18], %20 {strides = array<i32>} : memref<16x32xf32, #tpu.memory_space<vmem>>, vector<16x32xf32>,
    } else {
    }
    %c0 = arith.constant 0 : index
    %c0_1 = arith.constant 0 : index
    %3 = vector.load %arg2[%c0, %c0_1] : memref<16x32xbf16, #tpu.memory_space<vmem>>, vector<16x32xbf16>
    %c0_2 = arith.constant 0 : index
    %c0_3 = arith.constant 0 : index
    %4 = vector.load %arg3[%c0_2, %c0_3] : memref<32x64xbf16, #tpu.memory_space<vmem>>, vector<32x64xbf16>
    %cst = arith.constant dense<0.000000e+00> : vector<16x64xf32>
    %5 = tpu.matmul %3, %4, %cst {dimension_numbers = #tpu.dot_dimension_numbers<[1], [0], [0], [1], [0, 0, 1, 1], [], []>} : vector<16x32xbf16>, vector<32x64xbf16>, vector<16x64xf32> -> vector<16x64xf32>
    %c0_4 = arith.constant 0 : index
    %c0_5 = arith.constant 0 : index
    %6 = vector.load %arg4[%c0_4, %c0_5] : memref<1x64xf32, #tpu.memory_space<vmem>>, vector<1x64xf32>
    %7 = vector.broadcast %6 : vector<1x64xf32> to vector<16x64xf32>
    %8 = arith.addf %5, %7 : vector<16x64xf32>
    %cst_6 = arith.constant 0.000000e+00 : f32
    %9 = vector.broadcast %cst_6 : f32 to vector<16x64xf32>
    %10 = arith.maximumf %8, %9 : vector<16x64xf32>
    %c0_7 = arith.constant 0 : index
    %c0_8 = arith.constant 0 : index
    %11 = vector.load %arg10[%c0_7, %c0_8] : memref<16x32xf32, #tpu.memory_space<vmem>>, vector<16x32xf32>
    %12 = arith.truncf %10 : vector<16x64xf32> to vector<16x64xbf16>
    %c0_9 = arith.constant 0 : index
    %c0_10 = arith.constant 0 : index
    %13 = vector.load %arg5[%c0_9, %c0_10] : memref<64x32xbf16, #tpu.memory_space<vmem>>, vector<64x32xbf16>
    %cst_11 = arith.constant dense<0.000000e+00> : vector<16x32xf32>
    %14 = tpu.matmul %12, %13, %cst_11 {dimension_numbers = #tpu.dot_dimension_numbers<[1], [0], [0], [1], [0, 0, 1, 1], [], []>} : vector<16x64xbf16>, vector<64x32xbf16>, vector<16x32xf32> -> vector<16x32xf32>
    %15 = arith.addf %11, %14 : vector<16x32xf32>
    %c0_12 = arith.constant 0 : index
    %c0_13 = arith.constant 0 : index
    %16 = vector.load %arg10[%c0_12, %c0_13] : memref<16x32xf32, #tpu.memory_space<vmem>>, vector<16x32xf32>
    tpu.vector_store %arg10[%c0_12, %c0_13], %15 {strides = array<i32>} : memref<16x32xf32, #tpu.memory_space<vmem>>, vector<16x32xf32>,
    %c0_i32_14 = arith.constant 0 : i32
    %17 = arith.cmpi eq, %arg1, %c0_i32_14 : i32
    %18 = arith.extui %17 : i1 to i32
    %c0_i32_15 = arith.constant 0 : i32
    %19 = arith.cmpi ne, %18, %c0_i32_15 : i32
    scf.if %19 {
      %c0_16 = arith.constant 0 : index
      %c0_17 = arith.constant 0 : index
      %20 = vector.load %arg10[%c0_16, %c0_17] : memref<16x32xf32, #tpu.memory_space<vmem>>, vector<16x32xf32>
      %c0_18 = arith.constant 0 : index
      %c0_19 = arith.constant 0 : index
      %21 = vector.load %arg6[%c0_18, %c0_19] : memref<1x32xf32, #tpu.memory_space<vmem>>, vector<1x32xf32>
      %22 = vector.broadcast %21 : vector<1x32xf32> to vector<16x32xf32>
      %23 = arith.addf %20, %22 : vector<16x32xf32>
      %24 = arith.extf %3 : vector<16x32xbf16> to vector<16x32xf32>
      %25 = arith.addf %23, %24 : vector<16x32xf32>
      %cst_20 = arith.constant dense<0.000000e+00> : vector<16xf32>
      %26 = vector.multi_reduction <add>, %25, %cst_20 [1] : vector<16x32xf32> to vector<16xf32>
      %27 = vector.shape_cast %26 : vector<16xf32> to vector<16x1xf32>
      %cst_21 = arith.constant 3.200000e+01 : f32
      %28 = vector.broadcast %cst_21 : f32 to vector<16x1xf32>
      %29 = arith.divf %27, %28 : vector<16x1xf32>
      %30 = vector.broadcast %29 : vector<16x1xf32> to vector<16x32xf32>
      %31 = arith.subf %25, %30 : vector<16x32xf32>
      %32 = arith.mulf %31, %31 : vector<16x32xf32>
      %cst_22 = arith.constant dense<0.000000e+00> : vector<16xf32>
      %33 = vector.multi_reduction <add>, %32, %cst_22 [1] : vector<16x32xf32> to vector<16xf32>
      %34 = vector.shape_cast %33 : vector<16xf32> to vector<16x1xf32>
      %cst_23 = arith.constant 3.200000e+01 : f32
      %35 = vector.broadcast %cst_23 : f32 to vector<16x1xf32>
      %36 = arith.divf %34, %35 : vector<16x1xf32>
      %cst_24 = arith.constant 9.99999974E-6 : f32
      %37 = vector.broadcast %cst_24 : f32 to vector<16x1xf32>
      %38 = arith.addf %36, %37 : vector<16x1xf32>
      %39 = math.rsqrt %38 : vector<16x1xf32>
      %40 = vector.broadcast %39 : vector<16x1xf32> to vector<16x32xf32>
      %41 = arith.mulf %31, %40 : vector<16x32xf32>
      %c0_25 = arith.constant 0 : index
      %c0_26 = arith.constant 0 : index
      %42 = vector.load %arg7[%c0_25, %c0_26] : memref<1x32xf32, #tpu.memory_space<vmem>>, vector<1x32xf32>
      %43 = vector.broadcast %42 : vector<1x32xf32> to vector<16x32xf32>
      %44 = arith.mulf %41, %43 : vector<16x32xf32>
      %c0_27 = arith.constant 0 : index
      %c0_28 = arith.constant 0 : index
      %45 = vector.load %arg8[%c0_27, %c0_28] : memref<1x32xf32, #tpu.memory_space<vmem>>, vector<1x32xf32>
      %46 = vector.broadcast %45 : vector<1x32xf32> to vector<16x32xf32>
      %47 = arith.addf %44, %46 : vector<16x32xf32>
      %48 = arith.truncf %47 : vector<16x32xf32> to vector<16x32xbf16>
      %c0_29 = arith.constant 0 : index
      %c0_30 = arith.constant 0 : index
      %49 = vector.load %arg9[%c0_29, %c0_30] : memref<16x32xbf16, #tpu.memory_space<vmem>>, vector<16x32xbf16>
      tpu.vector_store %arg9[%c0_29, %c0_30], %48 {strides = array<i32>} : memref<16x32xbf16, #tpu.memory_space<vmem>>, vector<16x32xbf16>,
    } else {
    }
    return
  }
  func.func @transform_0(%arg0: i32, %arg1: i32) -> (i32, i32) {
    %c0_i32 = arith.constant 0 : i32
    %c0_i32_0 = arith.constant 0 : i32
    return %arg0, %c0_i32 : i32, i32
  }
  func.func @transform_1(%arg0: i32, %arg1: i32) -> (i32, i32) {
    %c0_i32 = arith.constant 0 : i32
    %c0_i32_0 = arith.constant 0 : i32
    return %c0_i32, %arg1 : i32, i32
  }
  func.func @transform_2(%arg0: i32, %arg1: i32) -> (i32, i32) {
    %c0_i32 = arith.constant 0 : i32
    %c0_i32_0 = arith.constant 0 : i32
    return %c0_i32, %arg1 : i32, i32
  }
  func.func @transform_3(%arg0: i32, %arg1: i32) -> (i32, i32) {
    %c0_i32 = arith.constant 0 : i32
    %c0_i32_0 = arith.constant 0 : i32
    return %arg1, %c0_i32 : i32, i32
  }
  func.func @transform_4(%arg0: i32, %arg1: i32) -> (i32, i32) {
    %c0_i32 = arith.constant 0 : i32
    %c0_i32_0 = arith.constant 0 : i32
    %c0_i32_1 = arith.constant 0 : i32
    return %c0_i32, %c0_i32_0 : i32, i32
  }
  func.func @transform_5(%arg0: i32, %arg1: i32) -> (i32, i32) {
    %c0_i32 = arith.constant 0 : i32
    %c0_i32_0 = arith.constant 0 : i32
    %c0_i32_1 = arith.constant 0 : i32
    return %c0_i32, %c0_i32_0 : i32, i32
  }
  func.func @transform_6(%arg0: i32, %arg1: i32) -> (i32, i32) {
    %c0_i32 = arith.constant 0 : i32
    %c0_i32_0 = arith.constant 0 : i32
    %c0_i32_1 = arith.constant 0 : i32
    return %c0_i32, %c0_i32_0 : i32, i32
  }
  func.func @transform_7(%arg0: i32, %arg1: i32) -> (i32, i32) {
    %c0_i32 = arith.constant 0 : i32
    %c0_i32_0 = arith.constant 0 : i32
    return %arg0, %c0_i32 : i32, i32
  }
}

</mosaic_0001>

<bundles_post_ra>
// kernel: transformer_forward.5
= control target key start
LH: loop header
LB: loop body
LE: loop exit
PB: predicated region body
PF: predicated region fallthrough
CT: control target
= control target key end

     0   :  { %s600_s15 = smov 0   ;;  %s602_s16 = smov 0   ;;  %s644_s0 = inlined_call_operand.vmem [shape: bf16[2,8,16], index: 0, kind: input, shape index: {}]   ;;  %s645_s1 = inlined_call_operand.vmem [shape: bf16[16,32], index: 1, kind: input, shape index: {}]   ;;  %s646_s2 = inlined_call_operand.vmem [shape: f32[1,32], index: 2, kind: input, shape index: {}]   ;;  %s647_s3 = inlined_call_operand.vmem [shape: f32[8,32], index: 3, kind: input, shape index: {}]   ;;  %s648_s4 = inlined_call_operand.vmem [shape: bf16[2,8,32], index: 4, kind: output, shape index: {}]  }
   0x1   :  { %s604_s17 = smov 0  }
   0x2 LB: > { %s33_s18 = sadd.s32 1, %s567_s16  ;;  %p506_p0 = scmp.ge.s32.totalorder %s571_s17, 1  ;;  %s571_s17 = sphi %s604_s17, %s14_s17   ;;  %s567_s16 = sphi %s602_s16, %s650_s16   ;;  %s563_s15 = sphi %s600_s15, %s649_s15  }
   0x3   : > { %p35_p1 = scmp.ge.s32.totalorder %s33_s18, 2  ;;  %p220_p2 = scmp.lt.s32.totalorder %s571_s17, 3 }
   0x5   : > { %s652_s18 = smov (%p35_p1, %s33_s18), 0  ;;  %p221_p3 = pnand %p506_p0, %p220_p2 }
   0x6   : > { %p265_p4 = scmp.lt.s32.totalorder (!%p221_p3), %s563_s15, 1 }
   0x7   : > { %224 = sbr.rel (%p221_p3) target bundleno = 227 (0xe3), region = 36 }
   0xc   : > { %vm300_vm0 = vcmask 261120   ;;  %v573_v0 = vmov 0.0   ;;  %v548_v1 = vld [vmem:[%s645_s1] sm:$0xff]   ;;  %vm574_vm1 = vmmov 0   ;;  %s654_s15 = smov (!%p265_p4, %s563_s15), 1  ;;  %vm312_vm2 = vcmask 130048  }
   0xd   : > { %301 = vst.msk [vmem:[#allocation2] sm:$0xff] %vm300_vm0, %v573_v0  ;;  %516 = vmatprep.subr.bf16.mxu0 %v573_v0  ;;  %518 = vmatprep.mubr.msk.bf16.mxu0 %vm574_vm1, %v573_v0  ;;  %s507_s21 = sshll.u32 %s654_s15, 2  ;;  %v511_v9 = vld [vmem:[%s646_s2] ss:$0 sm:$0xff]  ;;  %vm374_vm3 = vcmask 257024  }
   0xe   : > { %517 = vmatpush3.bf16.msra.mxu0 %v548_v1  ;;  %s271_s24 = scalar_lea.vmem %s644_s0, %s507_s21  ;;  %v371_v11 = vld [vmem:[%s647_s3] sm:$0xff]  ;;  %s294_s5 = scalar_lea.vmem %s648_s4, %s507_s21 }
   0xf   : > { %v303_v2 = vld [vmem:[%s271_s24] sm:$0xf] }
  0x11   : > { %519 = vmatmul.mubr.msk.bf16.vlgmr.msra.gmra.mxu0 %vm312_vm2, %v303_v2 }
  0x14   : > { %v302_v3 = vld [vmem:[#allocation2] sm:$0xff] }
  0xd1   : > { %v350_v4 = vpop.f32.mrf.mxu0 }
  0xd2   : > { %v356_v5 = vadd.f32 %v350_v4, %v302_v3 }
  0xd3   : > { %v520_v6 = vpop.f32.mrf.mxu0 }
  0xd4   : > { %358 = vst.msk [vmem:[#allocation2] sm:$0xff] %vm300_vm0, %v356_v5 }
  0xd5   : > { %v353_v7 = vpop.f32.mrf.mxu0 }
  0xd7   : > { %v521_v8 = vpop.f32.mrf.mxu0 }
  0xdb   : > { %v362_v10 = vld [vmem:[#allocation2] sm:$0xff] }
  0xdc   : > { %v370_v12 = vadd.f32 %v511_v9, %v362_v10 }
  0xde   : > { %v372_v13 = vadd.f32 %v371_v11, %v370_v12 }
  0xe0   : > { %v373_v14 = vpack.c.bf16 %v372_v13, %v372_v13 }
  0xe2   : > { %375 = vst.msk [vmem:[%s294_s5] sm:$0xf] %vm374_vm3, %v373_v14 }
  0xe3 PF: > { %s14_s17 = sadd.s32 1, %s571_s17   ;;  %s649_s15 = smov %s567_s16 }
  0xe4   : > { %p11_p5 = scmp.ge.s32.totalorder %s14_s17, 4   ;;  %s650_s16 = smov %s652_s18 }
  0xe6   :  { %13 = sbr.rel (!%p11_p5) target bundleno = 2 (0x2), region = 83 }

// kernel: transformer_forward.6
= control target key start
LH: loop header
LB: loop body
LE: loop exit
PB: predicated region body
PF: predicated region fallthrough
CT: control target
= control target key end

     0   :  { %s1424_s21 = smov 0   ;;  %s1426_s22 = smov 0   ;;  %s1585_s0 = inlined_call_operand.vmem [shape: bf16[2,8,32], index: 0, kind: input, shape index: {}, may-alias: {0,1}]   ;;  %s1586_s1 = inlined_call_operand.vmem [shape: bf16[2,8,32], index: 1, kind: input, shape index: {}, may-alias: {0,1}]   ;;  %s1587_s2 = inlined_call_operand.vmem [shape: bf16[4,32,8], index: 2, kind: input, shape index: {}]   ;;  %s1588_s3 = inlined_call_operand.vmem [shape: bf16[4,32,8], index: 3, kind: input, shape index: {}]   ;;  %s1589_s4 = inlined_call_operand.vmem [shape: bf16[4,32,8], index: 4, kind: input, shape index: {}]   ;;  %s1590_s5 = inlined_call_operand.vmem [shape: f32[4,1,8], index: 5, kind: input, shape index: {}]   ;;  %s1591_s6 = inlined_call_operand.vmem [shape: f32[4,1,8], index: 6, kind: input, shape index: {}]   ;;  %s1592_s7 = inlined_call_operand.vmem [shape: f32[4,1,8], index: 7, kind: input, shape index: {}]   ;;  %s1593_s8 = inlined_call_operand.vmem [shape: bf16[4,8,32], index: 8, kind: input, shape index: {}]   ;;  %s1594_s9 = inlined_call_operand.vmem [shape: f32[1,32], index: 9, kind: input, shape index: {}]   ;;  %s1595_s10 = inlined_call_operand.vmem [shape: f32[1,32], index: 10, kind: input, shape index: {}]   ;;  %s1596_s11 = inlined_call_operand.vmem [shape: f32[1,32], index: 11, kind: input, shape index: {}]   ;;  %s1597_s12 = inlined_call_operand.vmem [shape: bf16[2,8,32], index: 12, kind: output, shape index: {}]  }
   0x1   :  { %1601 = sst [smem:[#allocation8_spill]] %s1587_s2  ;;  %s1428_s23 = smov 0  }
   0x2   :  { %1602 = sst [smem:[#allocation9_spill]] %s1595_s10  ;;  %s1430_s24 = smov 0  }
   0x3   :  { %1603 = sst [smem:[#allocation10_spill]] %s1596_s11  ;;  %s1432_s25 = smov 0  }
   0x4 LB: > { %1604 = sst [smem:[#allocation3_spill]] %s1346_s23  ;;  %s34_s26 = sadd.s32 1, %s1346_s23  ;;  %s1354_s25 = sphi %s1432_s25, %s22_s25   ;;  %s1350_s24 = sphi %s1430_s24, %s1619_s24   ;;  %s1346_s23 = sphi %s1428_s23, %s1618_s23   ;;  %s1342_s22 = sphi %s1426_s22, %s1617_s22   ;;  %s1338_s21 = sphi %s1424_s21, %s1616_s21  }
   0x5   : > { %1605 = sst [smem:[#allocation4_spill]] %s1350_s24  ;;  %s41_s27 = sadd.s32 1, %s1350_s24 }
   0x6   : > { %1606 = sst [smem:[#allocation5_spill]] %s1354_s25  ;;  %p35_p0 = scmp.ge.s32.totalorder %s34_s26, 4 }
   0x7   : > { %p1168_p1 = scmp.ge.s32.totalorder %s1354_s25, 1  ;;  %p459_p2 = scmp.lt.s32.totalorder %s1354_s25, 9 }
   0x8   : > { %s1621_s26 = smov (%p35_p0, %s34_s26), 0  ;;  %s1623_s27 = smov (!%p35_p0, %s41_s27), %s1350_s24 }
   0x9   : > { %1607 = sst [smem:[#allocation6_spill]] %s1621_s26  ;;  %p460_p3 = pnand %p1168_p1, %p459_p2 }
   0xa   : > { %p43_p4 = scmp.ge.s32.totalorder %s1623_s27, 2  ;;  %p537_p5 = scmp.lt.s32.totalorder (!%p460_p3), %s1342_s22, 1 }
   0xb   : > { %463 = sbr.rel (%p460_p3) target bundleno = 1464 (0x5b8), region = 68  ;;  %p548_p6 = scmp.lt.s32.totalorder (!%p460_p3), %s1338_s21, 3 }
   0xc   : > { %s1625_s27 = smov (%p43_p4, %s1623_s27), 0  ;;  %s1609_s2 = sld [smem:[#allocation8_spill]] (!%p460_p3) }
   0xd   : > { %1608 = sst [smem:[#allocation7_spill]] %s1625_s27  ;;  %p1179_p7 = scmp.ne.s32.totalorder (!%p460_p3), %s1338_s21, 0 }
  0x10   : > { %s1627_s22 = smov (!%p537_p5, %s1342_s22), 1 }
  0x11   : > { %s1458_s28 = scalar_select %p548_p6, %s1338_s21, 3 }
  0x12   : > { %s1460_s29 = sshll.u32 %s1627_s22, 2 }
  0x13   : > { %s1201_s18 = sshll.u32 %s1458_s28, 4  ;;  %s568_s17 = scalar_lea.vmem %s1591_s6, %s1458_s28 }
  0x14   : > { %s552_s22 = scalar_lea.vmem %s1609_s2, %s1201_s18  ;;  %s557_s30 = scalar_lea.vmem %s1588_s3, %s1201_s18 }
  0x15   : > { %s1484_s14 = scalar_lea.vmem %s1589_s4, %s1201_s18  ;;  %s571_s20 = scalar_lea.vmem %s1592_s7, %s1458_s28 }
  0x16   : > { %s1177_s27 = sshll.u32 %s1458_s28, 2  ;;  %s582_s11 = scalar_lea.vmem %s1597_s12, %s1460_s29 }
  0x17   : > { %s1498_s2 = scalar_lea.vmem %s1593_s8, %s1177_s27  ;;  %587 = sbr.rel (%p1179_p7) target bundleno = 30 (0x1e), region = 72 }
  0x1c   : > { %vm588_vm0 = vcmask 261120   ;;  %v1356_v0 = vmov 0.0  }
  0x1d   : > { %589 = vst.msk [vmem:[#allocation2] sm:$0xff] %vm588_vm0, %v1356_v0 }
  0x1e PF: > { %v1304_v1 = vld [vmem:[%s557_s30 + $0x8] sm:$0xff]   ;;  %v1357_v2 = vmov 0.0   ;;  %v1306_v4 = vld [vmem:[%s557_s30] sm:$0xff]   ;;  %vm1358_vm1 = vmmov 0   ;;  %s1610_s18 = scalar_lea.vmem %s1585_s0, %s1460_s29  ;;  %vm615_vm2 = vcmask 261120   ;;  %s1611_s15 = scalar_lea.vmem %s1586_s1, %s1460_s29  ;;  %vm791_vm3 = vcmask 64512  }
  0x1f   : > { %1227 = vmatprep.subr.bf16.mxu1 %v1357_v2  ;;  %1219 = vmatprep.subr.bf16.mxu0 %v1357_v2  ;;  %v1305_v3 = vld [vmem:[%s552_s22 + $0x8] sm:$0xff]   ;;  %v1307_v5 = vld [vmem:[%s552_s22] sm:$0xff]   ;;  %s1612_s26 = scalar_lea.vmem %s1590_s5, %s1458_s28  ;;  %vm854_vm4 = vcmask 1043456   ;;  %p1195_p8 = scmp.ne.s32.totalorder %s1338_s21, 3 }
  0x20   : > { %1228 = vmatpush3.bf16.msra.mxu1 %v1304_v1  ;;  %1231 = vmatprep.mubr.msk.bf16.mxu1 %vm1358_vm1, %v1357_v2  ;;  %v590_v6 = vld [vmem:[%s1610_s18] sm:$0xf]  ;;  %v1308_v24 = vld [vmem:[%s1484_s14 + $0x8] sm:$0xff]   ;;  %s1614_s27 = sld [smem:[#allocation10_spill]] (!%p1195_p8) }
  0x21   : > { %1220 = vmatpush3.bf16.msra.mxu0 %v1305_v3  ;;  %1229 = vmatprep.subr.bf16.mxu1 %v1357_v2  ;;  %v1517_v7 = vld [vmem:[%s1611_s15] sm:$0xf] }
  0x22   : > { %1221 = vmatprep.subr.bf16.mxu0 %v1357_v2  ;;  %1223 = vmatprep.mubr.msk.bf16.mxu0 %vm1358_vm1, %v1357_v2  ;;  %v1184_v8 = vld [vmem:[%s568_s17] ss:$0 sm:$0xff] }
  0x23   : > { %v1180_v9 = vld [vmem:[%s1612_s26] ss:$0 sm:$0xff] }
  0x24   : > { %1230 = vmatpush3.bf16.msra.mxu1 %v1306_v4  ;;  %v1309_v25 = vld [vmem:[%s1484_s14] sm:$0xff]  }
  0x25   : > { %1222 = vmatpush3.bf16.msra.mxu0 %v1307_v5  ;;  %1243 = vmatprep.subr.bf16.mxu1 %v1357_v2  ;;  %v1188_v31 = vld [vmem:[%s571_s20] ss:$0 sm:$0xff]  ;;  %s1613_s20 = sld [smem:[#allocation9_spill]] (!%p1195_p8) }
  0x26   : > { %1235 = vmatprep.subr.bf16.mxu0 %v1357_v2  ;;  %v900_v44 = vld [vmem:[%s1498_s2] sm:$0xf] }
  0x27   : > { %1232 = vmatmul.mubr.msk.bf16.vlgmr.msra.gmra.mxu1 %vm615_vm2, %v590_v6  ;;  %v905_v45 = vsel %vm854_vm4, %v900_v44, 0  ;;  %v898_v55 = vld [vmem:[#allocation2] sm:$0xff] }
  0x28   : > { %1224 = vmatmul.mubr.msk.bf16.vlgmr.msra.gmra.mxu0 %vm615_vm2, %v1517_v7  ;;  %1245 = vmatprep.mubr.msk.bf16.mxu1 %vm1358_vm1, %v1357_v2 }
  0x29   : > { %1239 = vmatprep.mubr.msk.bf16.mxu0 %vm1358_vm1, %v1357_v2  ;;  %1236 = vmatpush3.bf16.msra.mxu0 %v1308_v24 }
  0x2a   : > { %1237 = vmatprep.subr.bf16.mxu0 %v1357_v2 }
  0x2d   : > { %1238 = vmatpush3.bf16.msra.mxu0 %v1309_v25 }
  0x2e   : > { %1249 = vmatprep.subr.bf16.mxu0 %v1357_v2 }
  0x30   : > { %1240 = vmatmul.mubr.msk.bf16.vlgmr.msra.gmra.mxu0 %vm615_vm2, %v590_v6 }
  0x31   : > { %1251 = vmatprep.mubr.msk.bf16.mxu0 %vm1358_vm1, %v1357_v2 }
  0xe7   : > { %v719_v10 = vpop.f32.mrf.mxu1 }
  0xe8   : > { %v720_v11 = vadd.f32 %v1184_v8, %v719_v10  ;;  %v653_v12 = vpop.f32.mrf.mxu0 }
  0xe9   : > { %v654_v13 = vadd.f32 %v1180_v9, %v653_v12  ;;  %v1233_v14 = vpop.f32.mrf.mxu1 }
  0xea   : > { %v790_v15 = vpack.c.bf16 %v720_v11, %v720_v11  ;;  %v1225_v16 = vpop.f32.mrf.mxu0 }
  0xeb   : > { %v722_v17 = vpop.f32.mrf.mxu1  ;;  %v788_v19 = vmul.f32 0.35355338, %v654_v13 }
  0xec   : > { %v796_v18 = vsel %vm791_vm3, %v790_v15, 0  ;;  %v656_v20 = vpop.f32.mrf.mxu0 }
  0xed   : > { %v1234_v21 = vpop.f32.mrf.mxu1  ;;  %1244 = vmatpush3.bf16.xpose.msra.mxu1 %v796_v18  ;;  %v789_v23 = vpack.c.bf16 %v788_v19, %v788_v19 }
  0xee   : > { %v1226_v22 = vpop.f32.mrf.mxu0  ;;  %1255 = vmatprep.subr.bf16.mxu1 %v1357_v2 }
  0xf0   : > { %v782_v32 = vpop.f32.mrf.mxu0 }
  0xf1   : > { %v783_v33 = vadd.f32 %v1188_v31, %v782_v32 }
  0xf2   : > { %v1241_v34 = vpop.f32.mrf.mxu0 }
  0xf3   : > { %v850_v35 = vpack.c.bf16 %v783_v33, %v783_v33 }
  0xf4   : > { %1246 = vmatmul.mubr.msk.bf16.vlgmr.msra.gmra.mxu1 %vm791_vm3, %v789_v23  ;;  %v785_v36 = vpop.f32.mrf.mxu0 }
  0xf5   : > { %1257 = vmatprep.mubr.msk.bf16.mxu1 %vm1358_vm1, %v1357_v2  ;;  %v856_v37 = vsel %vm854_vm4, %v850_v35, 0  ;;  %1256 = vmatpush3.bf16.msra.mxu1 %v905_v45 }
  0xf6   : > { %v1242_v38 = vpop.f32.mrf.mxu0  ;;  %1250 = vmatpush3.bf16.msra.mxu0 %v856_v37 }
 0x1b4   : > { %v832_v26 = vpop.f32.mrf.mxu1 }
 0x1b5   : > { %v838_v27 = vsel %vm791_vm3, %v832_v26, -inf }
 0x1b6   : > { %839 = vmax.xlane.f32.xlu0 %v838_v27  ;;  %v1247_v28 = vpop.f32.mrf.mxu1 }
 0x1b8   : > { %v835_v29 = vpop.f32.mrf.mxu1 }
 0x1ba   : > { %v1248_v30 = vpop.f32.mrf.mxu1 }
 0x23f   : > { %v840_v39 = vpop.xlane.xlu0 %839 }
 0x240   : > { %v841_v40 = vsub.f32 %v832_v26, %v840_v39 }
 0x242   : > { %v842_v41 = vmul.f32 1.442695, %v841_v40 }
 0x244   : > { %1310 = vpow2.f32 %v842_v41 }
 0x251   : > { %v1311_v42 = vpop.eup %1310 }
 0x252   : > { %v844_v43 = vsel %vm791_vm3, %v1311_v42, 0.0 }
 0x253   : > { %845 = vadd.xlane.f32.xlu0 %v844_v43 }
 0x2dc   : > { %v846_v46 = vpop.xlane.xlu0 %845 }
 0x2dd   : > { %1312 = vrcp.f32 %v846_v46 }
 0x2ea   : > { %v1313_v47 = vpop.eup %1312 }
 0x2eb   : > { %v848_v48 = vmul.f32 %v1313_v47, %v1311_v42 }
 0x2ed   : > { %v849_v49 = vpack.c.bf16 %v848_v48, %v848_v48 }
 0x2ef   : > { %1252 = vmatmul.mubr.msk.bf16.vlgmr.msra.gmra.mxu0 %vm791_vm3, %v849_v49 }
 0x3af   : > { %v892_v50 = vpop.f32.mrf.mxu0 }
 0x3b0   : > { %v899_v51 = vpack.c.bf16 %v892_v50, %v892_v50 }
 0x3b1   : > { %v1253_v52 = vpop.f32.mrf.mxu0 }
 0x3b2   : > { %1258 = vmatmul.mubr.msk.bf16.vlgmr.msra.gmra.mxu1 %vm791_vm3, %v899_v51 }
 0x3b3   : > { %v895_v53 = vpop.f32.mrf.mxu0 }
 0x3b5   : > { %v1254_v54 = vpop.f32.mrf.mxu0 }
 0x472   : > { %v941_v56 = vpop.f32.mrf.mxu1 }
 0x473   : > { %v947_v57 = vadd.f32 %v941_v56, %v898_v55 }
 0x474   : > { %v1259_v58 = vpop.f32.mrf.mxu1  ;;  %952 = sbr.rel (%p1195_p8) target bundleno = 1464 (0x5b8), region = 76 }
 0x475   : > { %948 = vst.msk [vmem:[#allocation2] sm:$0xff] %vm615_vm2, %v947_v57 }
 0x476   : > { %v944_v59 = vpop.f32.mrf.mxu1 }
 0x478   : > { %v1260_v60 = vpop.f32.mrf.mxu1 }
 0x479   : > { %v1196_v62 = vld [vmem:[%s1594_s9] ss:$0 sm:$0xff]  ;;  %v962_v63 = vunpack.c.l.bf16 %v1517_v7  ;;  %vm995_vm5 = vcmask 257024  }
 0x47a   : > { %v1197_v7 = vld [vmem:[%s1613_s20] ss:$0 sm:$0xff] }
 0x47b   : > { %v1198_v14 = vld [vmem:[%s1614_s27] ss:$0 sm:$0xff] }
 0x47c   : > { %v953_v61 = vld [vmem:[#allocation2] sm:$0xff] }
 0x47d   : > { %v961_v0 = vadd.f32 %v1196_v62, %v953_v61 }
 0x47f   : > { %v963_v1 = vadd.f32 %v962_v63, %v961_v0 }
 0x481   : > { %v964_v2 = vsel %vm615_vm2, %v963_v1, 0.0 }
 0x482   : > { %965 = vadd.xlane.f32.xlu0 %v964_v2 }
 0x50b   : > { %v966_v3 = vpop.xlane.xlu0 %965 }
 0x50c   : > { %v968_v4 = vmul.f32 0.03125, %v966_v3 }
 0x50e   : > { %v969_v5 = vsub.f32 %v963_v1, %v968_v4 }
 0x510   : > { %v970_v6 = vmul.f32 %v969_v5, %v969_v5 }
 0x512   : > { %v971_v8 = vsel %vm615_vm2, %v970_v6, 0.0 }
 0x513   : > { %972 = vadd.xlane.f32.xlu0 %v971_v8 }
 0x59c   : > { %v973_v9 = vpop.xlane.xlu0 %972 }
 0x59d   : > { %v974_v10 = vmul.f32 0.03125, %v973_v9 }
 0x59f   : > { %v975_v11 = vadd.f32 1e-05, %v974_v10 }
 0x5a1   : > { %1314 = vrsqrt.f32 %v975_v11 }
 0x5ae   : > { %v1315_v12 = vpop.eup %1314 }
 0x5af   : > { %v977_v13 = vmul.f32 %v1315_v12, %v969_v5 }
 0x5b1   : > { %v985_v15 = vmul.f32 %v1197_v7, %v977_v13 }
 0x5b3   : > { %v993_v16 = vadd.f32 %v1198_v14, %v985_v15 }
 0x5b5   : > { %v994_v17 = vpack.c.bf16 %v993_v16, %v993_v16 }
 0x5b7   : > { %996 = vst.msk [vmem:[%s582_s11] sm:$0xf] %vm995_vm5, %v994_v17 }
 0x5b8 PF: > { %s1615_s13 = sld [smem:[#allocation5_spill]] }
 0x5b9   : > { %s1616_s21 = sld [smem:[#allocation3_spill]] }
 0x5ba   : > { %s1617_s22 = sld [smem:[#allocation4_spill]] }
 0x5bb   : > { %s1618_s23 = sld [smem:[#allocation6_spill]] }
 0x5bc   : > { %s1619_s24 = sld [smem:[#allocation7_spill]] }
 0x5be   : > { %s22_s25 = sadd.s32 1, %s1615_s13  }
 0x5bf   : > { %p19_p9 = scmp.ge.s32.totalorder %s22_s25, 10  }
 0x5c1   :  { %21 = sbr.rel (!%p19_p9) target bundleno = 4 (0x4), region = 130 }

// kernel: transformer_forward.7
= control target key start
LH: loop header
LB: loop body
LE: loop exit
PB: predicated region body
PF: predicated region fallthrough
CT: control target
= control target key end

     0   :  { %vm31_vm0 = vcmask 261120   ;;  %v332_v0 = vmov 0.0   ;;  %vm333_vm1 = vmmov 0   ;;  %vm146_vm2 = vcmask 523264   ;;  %s422_s1 = inlined_call_operand.vmem [shape: bf16[32,64], index: 1, kind: input, shape index: {}]   ;;  %s423_s0 = inlined_call_operand.vmem [shape: bf16[16,32], index: 0, kind: input, shape index: {}]   ;;  %s424_s3 = inlined_call_operand.vmem [shape: bf16[64,32], index: 3, kind: input, shape index: {}]   ;;  %s425_s2 = inlined_call_operand.vmem [shape: f32[1,64], index: 2, kind: input, shape index: {}]   ;;  %s426_s4 = inlined_call_operand.vmem [shape: f32[1,32], index: 4, kind: input, shape index: {}]   ;;  %s427_s5 = inlined_call_operand.vmem [shape: f32[1,32], index: 5, kind: input, shape index: {}]   ;;  %s428_s6 = inlined_call_operand.vmem [shape: f32[1,32], index: 6, kind: input, shape index: {}]   ;;  %s429_s7 = inlined_call_operand.vmem [shape: bf16[16,32], index: 7, kind: output, shape index: {}]  }
   0x1   :  { %298 = vmatprep.subr.bf16.mxu0 %v332_v0  ;;  %v320_v1 = vld [vmem:[%s422_s1 + $0x8] sm:$0xff]   ;;  %302 = vmatprep.mubr.msk.bf16.mxu0 %vm333_vm1, %v332_v0  ;;  %32 = vst.msk [vmem:[#allocation2] sm:$0xff] %vm31_vm0, %v332_v0  ;;  %33 = vst.msk [vmem:[#allocation2 + $0x8] sm:$0xff] %vm31_vm0, %v332_v0  ;;  %v321_v2 = vld [vmem:[%s422_s1] sm:$0xff]   ;;  %vm266_vm3 = vcmask 257024  }
   0x2   :  { %306 = vmatprep.subr.bf16.mxu1 %v332_v0  ;;  %314 = vmatprep.mubr.msk.bf16.mxu1 %vm333_vm1, %v332_v0  ;;  %v34_v3 = vld [vmem:[%s423_s0] sm:$0xff]   ;;  %v323_v4 = vld [vmem:[%s424_s3 + $0x18] sm:$0xff]   ;;  %v324_v5 = vld [vmem:[%s424_s3 + $0x10] sm:$0xff]  }
   0x3   :  { %299 = vmatpush3.bf16.msra.mxu0 %v320_v1  ;;  %307 = vmatpush3.bf16.msra.mxu1 %v323_v4  ;;  %v325_v6 = vld [vmem:[%s424_s3 + $0x8] sm:$0xff]   ;;  %v326_v7 = vld [vmem:[%s424_s3] sm:$0xff]   ;;  %v209_v27 = vunpack.c.l.bf16 %v34_v3  ;;  %v210_v31 = vunpack.c.h.bf16 %v34_v3 }
   0x4   :  { %300 = vmatprep.subr.bf16.mxu0 %v332_v0  ;;  %308 = vmatprep.subr.bf16.mxu1 %v332_v0  ;;  %v273_v8 = vld [vmem:[%s425_s2] ss:$0 sm:$0xff] }
   0x5   :  { %v283_v26 = vld [vmem:[%s426_s4] ss:$0 sm:$0xff] }
   0x6   :  { %v284_v54 = vld [vmem:[%s427_s5] ss:$0 sm:$0xff] }
   0x7   :  { %301 = vmatpush3.bf16.msra.mxu0 %v321_v2  ;;  %309 = vmatpush3.bf16.msra.mxu1 %v324_v5  ;;  %v285_v56 = vld [vmem:[%s428_s6] ss:$0 sm:$0xff] }
   0x8   :  { %310 = vmatprep.subr.bf16.mxu1 %v332_v0  ;;  %v111_v18 = vld [vmem:[#allocation2] sm:$0xff]  ;;  %v112_v22 = vld [vmem:[#allocation2 + $0x8] sm:$0xff] }
   0xa   :  { %303 = vmatmul.mubr.msk.bf16.vlgmr.msra.gmra.mxu0 %vm31_vm0, %v34_v3 }
   0xb   :  { %311 = vmatpush3.bf16.msra.mxu1 %v325_v6 }
   0xc   :  { %312 = vmatprep.subr.bf16.mxu1 %v332_v0 }
   0xf   :  { %313 = vmatpush3.bf16.msra.mxu1 %v326_v7 }
  0xca   :  { %v102_v9 = vpop.f32.mrf.mxu0 }
  0xcb   :  { %v103_v11 = vadd.f32 %v273_v8, %v102_v9 }
  0xcc   :  { %v304_v10 = vpop.f32.mrf.mxu0 }
  0xcd   :  { %v109_v15 = vmax.f32 %v103_v11, 0.0 }
  0xce   :  { %v105_v12 = vpop.f32.mrf.mxu0 }
  0xcf   :  { %v106_v13 = vadd.f32 %v273_v8, %v105_v12 }
  0xd0   :  { %v305_v14 = vpop.f32.mrf.mxu0 }
  0xd1   :  { %v110_v16 = vmax.f32 %v106_v13, 0.0 }
  0xd3   :  { %v113_v17 = vpack.c.bf16 %v110_v16, %v109_v15 }
  0xd5   :  { %315 = vmatmul.mubr.msk.bf16.vlgmr.msra.gmra.mxu1 %vm146_vm2, %v113_v17 }
 0x195   :  { %v184_v19 = vpop.f32.mrf.mxu1 }
 0x196   :  { %v191_v20 = vadd.f32 %v184_v19, %v111_v18 }
 0x197   :  { %v316_v21 = vpop.f32.mrf.mxu1 }
 0x198   :  { %193 = vst.msk [vmem:[#allocation2] sm:$0xff] %vm31_vm0, %v191_v20 }
 0x199   :  { %v187_v23 = vpop.f32.mrf.mxu1 }
 0x19a   :  { %v192_v24 = vadd.f32 %v187_v23, %v112_v22 }
 0x19b   :  { %v317_v25 = vpop.f32.mrf.mxu1 }
 0x19c   :  { %194 = vst.msk [vmem:[#allocation2 + $0x8] sm:$0xff] %vm31_vm0, %v192_v24 }
 0x19f   :  { %v198_v28 = vld [vmem:[#allocation2] sm:$0xff] }
 0x1a0   :  { %v207_v29 = vadd.f32 %v283_v26, %v198_v28 }
 0x1a2   :  { %v211_v30 = vadd.f32 %v209_v27, %v207_v29 }
 0x1a3   :  { %v199_v32 = vld [vmem:[#allocation2 + $0x8] sm:$0xff] }
 0x1a4   :  { %v213_v33 = vsel %vm31_vm0, %v211_v30, 0.0  ;;  %v208_v34 = vadd.f32 %v283_v26, %v199_v32 }
 0x1a5   :  { %214 = vadd.xlane.f32.xlu0 %v213_v33 }
 0x1a6   :  { %v212_v35 = vadd.f32 %v210_v31, %v208_v34 }
 0x1a8   :  { %v216_v36 = vsel %vm31_vm0, %v212_v35, 0.0 }
 0x1a9   :  { %217 = vadd.xlane.f32.xlu0 %v216_v36 }
 0x22e   :  { %v215_v37 = vpop.xlane.xlu0 %214 }
 0x22f   :  { %v220_v38 = vmul.f32 0.03125, %v215_v37 }
 0x231   :  { %v222_v39 = vsub.f32 %v211_v30, %v220_v38 }
 0x232   :  { %v218_v40 = vpop.xlane.xlu0 %217 }
 0x233   :  { %v221_v41 = vmul.f32 0.03125, %v218_v40  ;;  %v224_v42 = vmul.f32 %v222_v39, %v222_v39 }
 0x235   :  { %v223_v43 = vsub.f32 %v212_v35, %v221_v41  ;;  %v226_v44 = vsel %vm31_vm0, %v224_v42, 0.0 }
 0x236   :  { %227 = vadd.xlane.f32.xlu1 %v226_v44 }
 0x237   :  { %v225_v45 = vmul.f32 %v223_v43, %v223_v43 }
 0x239   :  { %v229_v46 = vsel %vm31_vm0, %v225_v45, 0.0 }
 0x23a   :  { %230 = vadd.xlane.f32.xlu1 %v229_v46 }
 0x2bf   :  { %v228_v47 = vpop.xlane.xlu1 %227 }
 0x2c0   :  { %v232_v48 = vmul.f32 0.03125, %v228_v47 }
 0x2c2   :  { %v234_v49 = vadd.f32 1e-05, %v232_v48 }
 0x2c3   :  { %v231_v50 = vpop.xlane.xlu1 %230 }
 0x2c4   :  { %328 = vrsqrt.f32 %v234_v49  ;;  %v233_v51 = vmul.f32 0.03125, %v231_v50 }
 0x2c6   :  { %v235_v52 = vadd.f32 1e-05, %v233_v51 }
 0x2c8   :  { %330 = vrsqrt.f32 %v235_v52 }
 0x2d1   :  { %v329_v53 = vpop.eup %328 }
 0x2d2   :  { %v238_v55 = vmul.f32 %v329_v53, %v222_v39 }
 0x2d4   :  { %v247_v57 = vmul.f32 %v284_v54, %v238_v55 }
 0x2d5   :  { %v331_v58 = vpop.eup %330 }
 0x2d6   :  { %v256_v59 = vadd.f32 %v285_v56, %v247_v57  ;;  %v239_v60 = vmul.f32 %v331_v58, %v223_v43 }
 0x2d8   :  { %v288_v61 = vpack.c.bf16 %v256_v59, %v256_v59  ;;  %v248_v62 = vmul.f32 %v284_v54, %v239_v60 }
 0x2da   :  { %267 = vst.msk [vmem:[%s429_s7] sm:$0xf] %vm266_vm3, %v288_v61  ;;  %v257_v63 = vadd.f32 %v285_v56, %v248_v62 }
 0x2dc   :  { %v289_v0 = vpack.c.bf16 %v257_v63, %v257_v63 }
 0x2de   :  { %268 = vst.msk [vmem:[%s429_s7 + $0x4] sm:$0xf] %vm266_vm3, %v289_v0 }

</bundles_post_ra>
